<compile_context>
chip_gen: v7x
topology: tpu7x:2x2x1
jax: 0.10.0
libtpu: 0.0.40
codegen_flags: <defaults>
</compile_context>

<pallas_src>
from functools import partial

import jax
import jax.numpy as jnp
from jax.experimental import pallas as pl
from jax.experimental.pallas import tpu as pltpu

EPS = 1e-5
_LANE = 128


def _slot(f):
    """Width of a 128-lane-aligned slot holding an f-wide [1,f] parameter."""
    return pl.cdiv(f, _LANE) * _LANE


def _bn_relu(h, gamma, beta):
    """Training-mode BatchNorm1d + ReLU folded into ONE mul+add pass over [B,F].

    var = E[h^2] - E[h]^2 (biased), s = gamma*rsqrt(var+eps), b' = beta - mean*s,
    out = relu(h*s + b').  Only h*h, h*s, +b', max touch the full [B,F] tile.
    """
    mean = jnp.mean(h, axis=0, keepdims=True)
    meansq = jnp.mean(h * h, axis=0, keepdims=True)
    var = meansq - mean * mean                       # biased batch variance
    s = gamma * jax.lax.rsqrt(var + EPS)             # [1,F], cheap
    b = beta - mean * s                              # [1,F], cheap
    return jnp.maximum(h * s + b, 0.0)


def _encoder_kernel(feat_dims, head_pad, mm_dtype, *refs):
    """All-in-VMEM kernel: split first matmul -> (BN+ReLU+Linear)*L -> fused heads.

    refs order:
      x, c,                       # activations (already cast to mm_dtype)
      w0_x, w0_c,                 # split first-layer weight
      w_1 .. w_{L-1},             # remaining hidden-layer weights
      w_heads,                    # fused + lane-padded mu/var head weight
      bn_packed,                  # [1, total] packed gamma/beta per layer + head bias
      out                         # (B, head_pad) lane-dense output
    Hidden Linear biases are intentionally dropped (cancelled by BN mean sub).
    """
    num_hidden = len(feat_dims)
    x_ref, c_ref = refs[0], refs[1]
    w0x_ref, w0c_ref = refs[2], refs[3]
    w_refs = refs[4:4 + (num_hidden - 1)]
    wh_ref = refs[4 + (num_hidden - 1)]
    bn_ref = refs[5 + (num_hidden - 1)]
    out_ref = refs[6 + (num_hidden - 1)]

    # First hidden layer: concat([x, c]) replaced by a split matmul
    # (no lane-axis shuffle through the XLU).
    h = (jnp.dot(x_ref[...], w0x_ref[...], preferred_element_type=jnp.float32)
         + jnp.dot(c_ref[...], w0c_ref[...], preferred_element_type=jnp.float32))

    off = 0
    for i in range(num_hidden):
        f = feat_dims[i]
        sl = _slot(f)
        gamma = bn_ref[:, off:off + f]              # static, tile-aligned slices
        beta = bn_ref[:, off + sl:off + sl + f]
        off += 2 * sl
        h = _bn_relu(h, gamma, beta)
        if i + 1 < num_hidden:
            h = jnp.dot(h.astype(mm_dtype), w_refs[i][...],
                        preferred_element_type=jnp.float32)

    # Fused mu/var heads: one matmul into a 128-lane-dense padded output block
    # (padding keeps the store unmasked; see module docstring).
    b_heads = bn_ref[:, off:off + head_pad]
    out_ref[...] = (jnp.dot(h.astype(mm_dtype), wh_ref[...],
                            preferred_element_type=jnp.float32) + b_heads)


def prepare_params(params, in_dim, latent_dim, matmul_dtype=jnp.float32):
    """ONE-TIME parameter fusion (hoisted out of the per-call path).

    Splits the first Linear weight (kills the concat), fuses + lane-pads the
    mu/var head weights, packs all tiny [1,F] params into a single buffer,
    and casts matmul operands to `matmul_dtype` (bf16 recommended on v6e/v7x).
    """
    hidden = params["hidden"]
    feat_dims = tuple(w.shape[1] for (w, _b, _g, _bt) in hidden)

    w0 = hidden[0][0]                                 # [in_dim + con_dim, dims[1]]
    w0_x = w0[:in_dim, :].astype(matmul_dtype)
    w0_c = w0[in_dim:, :].astype(matmul_dtype)
    w_hidden = tuple(w.astype(matmul_dtype) for (w, _b, _g, _bt) in hidden[1:])

    last = params["w_mu"].shape[0]
    two_lat = 2 * latent_dim
    head_pad = _slot(two_lat)                         # full 128-lane output tile
    w_heads = jnp.zeros((last, head_pad), jnp.float32)
    w_heads = w_heads.at[:, :latent_dim].set(params["w_mu"])
    w_heads = w_heads.at[:, latent_dim:two_lat].set(params["w_var"])
    w_heads = w_heads.astype(matmul_dtype)

    # Pack gamma_i, beta_i (per layer) and the fused head bias into one
    # [1, total] buffer of 128-aligned slots -> a single kernel input.
    total = sum(2 * _slot(f) for f in feat_dims) + head_pad
    bn_packed = jnp.zeros((1, total), jnp.float32)
    off = 0
    for (_w, _b, g, bt), f in zip(hidden, feat_dims):
        sl = _slot(f)
        bn_packed = bn_packed.at[:, off:off + f].set(g.reshape(1, f))
        bn_packed = bn_packed.at[:, off + sl:off + sl + f].set(bt.reshape(1, f))
        off += 2 * sl
    bn_packed = bn_packed.at[:, off:off + latent_dim].set(
        params["b_mu"].reshape(1, latent_dim))
    bn_packed = bn_packed.at[:, off + latent_dim:off + two_lat].set(
        params["b_var"].reshape(1, latent_dim))
    # NOTE: hidden-layer Linear biases are intentionally NOT packed - they are
    # exactly cancelled by the training-mode BN mean subtraction.

    return {"w0_x": w0_x, "w0_c": w0_c, "w_hidden": w_hidden,
            "w_heads": w_heads, "bn_packed": bn_packed}


@partial(jax.jit, static_argnames=("latent_dim",))
def encoder_forward(x, c, fused, latent_dim):
    """Per-call path: one Pallas call, everything resident in VMEM."""
    B = x.shape[0]
    mm_dtype = fused["w0_x"].dtype
    feat_dims = (fused["w0_x"].shape[1],) + tuple(w.shape[1] for w in fused["w_hidden"])
    head_pad = fused["w_heads"].shape[1]
    last = fused["w_heads"].shape[0]

    x_mm = x.astype(mm_dtype)
    c_mm = c.astype(mm_dtype)
    flat_inputs = [x_mm, c_mm, fused["w0_x"], fused["w0_c"],
                   *fused["w_hidden"], fused["w_heads"], fused["bn_packed"]]

    # Advisory cost estimate (helps XLA overlap this tiny call).
    in_dim, con_dim = x.shape[1], c.shape[1]
    layer_dims = [in_dim + con_dim] + list(feat_dims)
    matmul_flops = 2 * B * sum(layer_dims[i] * layer_dims[i + 1]
                               for i in range(len(layer_dims) - 1))
    matmul_flops += 2 * B * last * head_pad
    elementwise_flops = 5 * B * sum(feat_dims)              # h*h, h*s, +b', relu, head add
    transcendentals = sum(feat_dims)                         # one rsqrt per feature
    bytes_accessed = sum(int(a.size) * a.dtype.itemsize for a in flat_inputs) \
        + 4 * B * head_pad
    cost = pl.CostEstimate(flops=int(matmul_flops + elementwise_flops),
                           transcendentals=int(transcendentals),
                           bytes_accessed=int(bytes_accessed))

    vmem_spec = pl.BlockSpec(memory_space=pltpu.MemorySpace.VMEM)

    out = pl.pallas_call(
        partial(_encoder_kernel, feat_dims, head_pad, mm_dtype),
        out_shape=jax.ShapeDtypeStruct((B, head_pad), jnp.float32),
        in_specs=[vmem_spec] * len(flat_inputs),
        out_specs=vmem_spec,
        compiler_params=pltpu.CompilerParams(
            # Conservative scoped-VMEM budget; fits v7x (64 MiB phys) with headroom.
            vmem_limit_bytes=32 * 1024 * 1024),
        cost_estimate=cost,
    )(*flat_inputs)

    z_mu = out[:, :latent_dim]
    z_var = out[:, latent_dim:2 * latent_dim]
    return z_mu, z_var


def init_params(key, dims, latent_dim, con_dim):
    """Deterministic synthetic parameters matching the module shapes (PyTorch-like init)."""
    params = {"hidden": []}
    layer_dims = [dims[0] + con_dim] + list(dims[1:])
    keys = jax.random.split(key, 2 * len(layer_dims) + 4)
    k = 0
    for i in range(len(layer_dims) - 1):
        fan_in, fan_out = layer_dims[i], layer_dims[i + 1]
        bound = 1.0 / jnp.sqrt(fan_in)
        w = jax.random.uniform(keys[k], (fan_in, fan_out), jnp.float32, -bound, bound)
        b = jax.random.uniform(keys[k + 1], (1, fan_out), jnp.float32, -bound, bound)
        k += 2
        gamma = jnp.ones((1, fan_out), jnp.float32)
        beta = jnp.zeros((1, fan_out), jnp.float32)
        params["hidden"].append((w, b, gamma, beta))

    last = dims[-1]
    bound = 1.0 / jnp.sqrt(last)
    params["w_mu"] = jax.random.uniform(keys[k], (last, latent_dim), jnp.float32, -bound, bound)
    params["b_mu"] = jax.random.uniform(keys[k + 1], (1, latent_dim), jnp.float32, -bound, bound)
    params["w_var"] = jax.random.uniform(keys[k + 2], (last, latent_dim), jnp.float32, -bound, bound)
    params["b_var"] = jax.random.uniform(keys[k + 3], (1, latent_dim), jnp.float32, -bound, bound)
    return params


def encoder_ref(x, c, params):
    """Pure-JAX reference implementing the full PyTorch semantics (with biases)."""
    h = jnp.concatenate([x, c], axis=1)
    for (w, b, g, bt) in params["hidden"]:
        h = h @ w + b
        mean = jnp.mean(h, axis=0, keepdims=True)
        var = jnp.mean((h - mean) ** 2, axis=0, keepdims=True)
        h = (h - mean) / jnp.sqrt(var + EPS) * g + bt
        h = jnp.maximum(h, 0.0)
    mu = h @ params["w_mu"] + params["b_mu"]
    var = h @ params["w_var"] + params["b_var"]
    return mu, var


if __name__ == "__main__":
    # Small, module-consistent shapes: dims = [16, 32, 16], con_dim = 8, latent = 4.
    dims = [16, 32, 16]
    con_dim = 8
    latent_dim = 4
    B = 8  # multiple of 8 (f32 sublane)

    key = jax.random.PRNGKey(0)
    kx, kc, kp = jax.random.split(key, 3)
    x = jax.random.normal(kx, (B, dims[0]), jnp.float32)
    c = jax.random.normal(kc, (B, con_dim), jnp.float32)
    params = init_params(kp, dims, latent_dim, con_dim)

    ref_mu, ref_var = encoder_ref(x, c, params)

    # --- f32 matmul path (exactness check against the PyTorch-semantics reference) ---
    fused_f32 = prepare_params(params, dims[0], latent_dim, matmul_dtype=jnp.float32)
    z_mu, z_var = encoder_forward(x, c, fused_f32, latent_dim)
    jax.block_until_ready((z_mu, z_var))
    assert jnp.allclose(z_mu, ref_mu, atol=1e-4, rtol=1e-4)
    assert jnp.allclose(z_var, ref_var, atol=1e-4, rtol=1e-4)

    # --- bf16 matmul path (v6e/v7x native-bf16 MXU; f32 accumulation & BN stats) ---
    fused_bf16 = prepare_params(params, dims[0], latent_dim, matmul_dtype=jnp.bfloat16)
    z_mu_b, z_var_b = encoder_forward(x, c, fused_bf16, latent_dim)
    jax.block_until_ready((z_mu_b, z_var_b))
    assert jnp.allclose(z_mu_b, ref_mu, atol=0.15, rtol=0.15)
    assert jnp.allclose(z_var_b, ref_var, atol=0.15, rtol=0.15)

    print("KERNEL_OK")
</pallas_src>

<mosaic_0001>
module attributes {stable_mosaic.version = 11 : i64} {
  func.func @_encoder_kernel(%arg0: memref<8x16xf32, #tpu.memory_space<vmem>>, %arg1: memref<8x8xf32, #tpu.memory_space<vmem>>, %arg2: memref<16x32xf32, #tpu.memory_space<vmem>>, %arg3: memref<8x32xf32, #tpu.memory_space<vmem>>, %arg4: memref<32x16xf32, #tpu.memory_space<vmem>>, %arg5: memref<16x128xf32, #tpu.memory_space<vmem>>, %arg6: memref<1x640xf32, #tpu.memory_space<vmem>>, %arg7: memref<8x128xf32, #tpu.memory_space<vmem>>) attributes {dimension_semantics = [], scalar_prefetch = 0 : i64, scratch_operands = 0 : i64, tpu.core_type = #tpu.core_type<tc>} {
    %c0 = arith.constant 0 : index
    %c0_0 = arith.constant 0 : index
    %0 = vector.load %arg0[%c0, %c0_0] : memref<8x16xf32, #tpu.memory_space<vmem>>, vector<8x16xf32>
    %c0_1 = arith.constant 0 : index
    %c0_2 = arith.constant 0 : index
    %1 = vector.load %arg2[%c0_1, %c0_2] : memref<16x32xf32, #tpu.memory_space<vmem>>, vector<16x32xf32>
    %cst = arith.constant dense<0.000000e+00> : vector<8x32xf32>
    %2 = tpu.matmul %0, %1, %cst {dimension_numbers = #tpu.dot_dimension_numbers<[1], [0], [0], [1], [0, 0, 1, 1], [], []>} : vector<8x16xf32>, vector<16x32xf32>, vector<8x32xf32> -> vector<8x32xf32>
    %c0_3 = arith.constant 0 : index
    %c0_4 = arith.constant 0 : index
    %3 = vector.load %arg1[%c0_3, %c0_4] : memref<8x8xf32, #tpu.memory_space<vmem>>, vector<8x8xf32>
    %c0_5 = arith.constant 0 : index
    %c0_6 = arith.constant 0 : index
    %4 = vector.load %arg3[%c0_5, %c0_6] : memref<8x32xf32, #tpu.memory_space<vmem>>, vector<8x32xf32>
    %cst_7 = arith.constant dense<0.000000e+00> : vector<8x32xf32>
    %5 = tpu.matmul %3, %4, %cst_7 {dimension_numbers = #tpu.dot_dimension_numbers<[1], [0], [0], [1], [0, 0, 1, 1], [], []>} : vector<8x8xf32>, vector<8x32xf32>, vector<8x32xf32> -> vector<8x32xf32>
    %6 = arith.addf %2, %5 : vector<8x32xf32>
    %c0_8 = arith.constant 0 : index
    %c0_9 = arith.constant 0 : index
    %7 = vector.load %arg6[%c0_8, %c0_9] : memref<1x640xf32, #tpu.memory_space<vmem>>, vector<1x32xf32>
    %c0_10 = arith.constant 0 : index
    %c128 = arith.constant 128 : index
    %8 = vector.load %arg6[%c0_10, %c128] : memref<1x640xf32, #tpu.memory_space<vmem>>, vector<1x32xf32>
    %cst_11 = arith.constant dense<0.000000e+00> : vector<32xf32>
    %9 = vector.multi_reduction <add>, %6, %cst_11 [0] : vector<8x32xf32> to vector<32xf32>
    %10 = vector.shape_cast %9 : vector<32xf32> to vector<1x32xf32>
    %cst_12 = arith.constant 8.000000e+00 : f32
    %11 = vector.broadcast %cst_12 : f32 to vector<1x32xf32>
    %12 = arith.divf %10, %11 : vector<1x32xf32>
    %13 = arith.mulf %6, %6 : vector<8x32xf32>
    %cst_13 = arith.constant dense<0.000000e+00> : vector<32xf32>
    %14 = vector.multi_reduction <add>, %13, %cst_13 [0] : vector<8x32xf32> to vector<32xf32>
    %15 = vector.shape_cast %14 : vector<32xf32> to vector<1x32xf32>
    %cst_14 = arith.constant 8.000000e+00 : f32
    %16 = vector.broadcast %cst_14 : f32 to vector<1x32xf32>
    %17 = arith.divf %15, %16 : vector<1x32xf32>
    %18 = arith.mulf %12, %12 : vector<1x32xf32>
    %19 = arith.subf %17, %18 : vector<1x32xf32>
    %cst_15 = arith.constant 9.99999974E-6 : f32
    %20 = vector.broadcast %cst_15 : f32 to vector<1x32xf32>
    %21 = arith.addf %19, %20 : vector<1x32xf32>
    %22 = math.rsqrt %21 : vector<1x32xf32>
    %23 = arith.mulf %7, %22 : vector<1x32xf32>
    %24 = arith.mulf %12, %23 : vector<1x32xf32>
    %25 = arith.subf %8, %24 : vector<1x32xf32>
    %26 = vector.broadcast %23 : vector<1x32xf32> to vector<8x32xf32>
    %27 = arith.mulf %6, %26 : vector<8x32xf32>
    %28 = vector.broadcast %25 : vector<1x32xf32> to vector<8x32xf32>
    %29 = arith.addf %27, %28 : vector<8x32xf32>
    %cst_16 = arith.constant 0.000000e+00 : f32
    %30 = vector.broadcast %cst_16 : f32 to vector<8x32xf32>
    %31 = arith.maximumf %29, %30 : vector<8x32xf32>
    %c0_17 = arith.constant 0 : index
    %c0_18 = arith.constant 0 : index
    %32 = vector.load %arg4[%c0_17, %c0_18] : memref<32x16xf32, #tpu.memory_space<vmem>>, vector<32x16xf32>
    %cst_19 = arith.constant dense<0.000000e+00> : vector<8x16xf32>
    %33 = tpu.matmul %31, %32, %cst_19 {dimension_numbers = #tpu.dot_dimension_numbers<[1], [0], [0], [1], [0, 0, 1, 1], [], []>} : vector<8x32xf32>, vector<32x16xf32>, vector<8x16xf32> -> vector<8x16xf32>
    %c0_20 = arith.constant 0 : index
    %c256 = arith.constant 256 : index
    %34 = vector.load %arg6[%c0_20, %c256] : memref<1x640xf32, #tpu.memory_space<vmem>>, vector<1x16xf32>
    %c0_21 = arith.constant 0 : index
    %c384 = arith.constant 384 : index
    %35 = vector.load %arg6[%c0_21, %c384] : memref<1x640xf32, #tpu.memory_space<vmem>>, vector<1x16xf32>
    %cst_22 = arith.constant dense<0.000000e+00> : vector<16xf32>
    %36 = vector.multi_reduction <add>, %33, %cst_22 [0] : vector<8x16xf32> to vector<16xf32>
    %37 = vector.shape_cast %36 : vector<16xf32> to vector<1x16xf32>
    %cst_23 = arith.constant 8.000000e+00 : f32
    %38 = vector.broadcast %cst_23 : f32 to vector<1x16xf32>
    %39 = arith.divf %37, %38 : vector<1x16xf32>
    %40 = arith.mulf %33, %33 : vector<8x16xf32>
    %cst_24 = arith.constant dense<0.000000e+00> : vector<16xf32>
    %41 = vector.multi_reduction <add>, %40, %cst_24 [0] : vector<8x16xf32> to vector<16xf32>
    %42 = vector.shape_cast %41 : vector<16xf32> to vector<1x16xf32>
    %cst_25 = arith.constant 8.000000e+00 : f32
    %43 = vector.broadcast %cst_25 : f32 to vector<1x16xf32>
    %44 = arith.divf %42, %43 : vector<1x16xf32>
    %45 = arith.mulf %39, %39 : vector<1x16xf32>
    %46 = arith.subf %44, %45 : vector<1x16xf32>
    %cst_26 = arith.constant 9.99999974E-6 : f32
    %47 = vector.broadcast %cst_26 : f32 to vector<1x16xf32>
    %48 = arith.addf %46, %47 : vector<1x16xf32>
    %49 = math.rsqrt %48 : vector<1x16xf32>
    %50 = arith.mulf %34, %49 : vector<1x16xf32>
    %51 = arith.mulf %39, %50 : vector<1x16xf32>
    %52 = arith.subf %35, %51 : vector<1x16xf32>
    %53 = vector.broadcast %50 : vector<1x16xf32> to vector<8x16xf32>
    %54 = arith.mulf %33, %53 : vector<8x16xf32>
    %55 = vector.broadcast %52 : vector<1x16xf32> to vector<8x16xf32>
    %56 = arith.addf %54, %55 : vector<8x16xf32>
    %cst_27 = arith.constant 0.000000e+00 : f32
    %57 = vector.broadcast %cst_27 : f32 to vector<8x16xf32>
    %58 = arith.maximumf %56, %57 : vector<8x16xf32>
    %c0_28 = arith.constant 0 : index
    %c512 = arith.constant 512 : index
    %59 = vector.load %arg6[%c0_28, %c512] : memref<1x640xf32, #tpu.memory_space<vmem>>, vector<1x128xf32>
    %c0_29 = arith.constant 0 : index
    %c0_30 = arith.constant 0 : index
    %60 = vector.load %arg5[%c0_29, %c0_30] : memref<16x128xf32, #tpu.memory_space<vmem>>, vector<16x128xf32>
    %cst_31 = arith.constant dense<0.000000e+00> : vector<8x128xf32>
    %61 = tpu.matmul %58, %60, %cst_31 {dimension_numbers = #tpu.dot_dimension_numbers<[1], [0], [0], [1], [0, 0, 1, 1], [], []>} : vector<8x16xf32>, vector<16x128xf32>, vector<8x128xf32> -> vector<8x128xf32>
    %62 = vector.broadcast %59 : vector<1x128xf32> to vector<8x128xf32>
    %63 = arith.addf %61, %62 : vector<8x128xf32>
    %c0_32 = arith.constant 0 : index
    %c0_33 = arith.constant 0 : index
    %64 = vector.load %arg7[%c0_32, %c0_33] : memref<8x128xf32, #tpu.memory_space<vmem>>, vector<8x128xf32>
    tpu.vector_store %arg7[%c0_32, %c0_33], %63 {strides = array<i32>} : memref<8x128xf32, #tpu.memory_space<vmem>>, vector<8x128xf32>,
    return
  }
}

</mosaic_0001>

<bundles_post_ra>
// kernel: encoder_forward.1
= control target key start
LH: loop header
LB: loop body
LE: loop exit
PB: predicated region body
PF: predicated region fallthrough
CT: control target
= control target key end

     0   :  { %12 = vsyncpa [#allocation3], 0  ;;  %s534_s24 = smov [#allocation2]   ;;  %s649_s0 = inlined_call_operand.vmem [shape: f32[8,16], index: 0, kind: input, shape index: {}]   ;;  %s650_s1 = inlined_call_operand.vmem [shape: f32[8,8], index: 1, kind: input, shape index: {}]   ;;  %s651_s2 = inlined_call_operand.vmem [shape: f32[16,32], index: 2, kind: input, shape index: {}]   ;;  %s652_s3 = inlined_call_operand.hbm [shape: f32[8,32], index: 3, kind: input, shape index: {}]   ;;  %s653_s4 = inlined_call_operand.vmem [shape: f32[32,16], index: 4, kind: input, shape index: {}]   ;;  %s654_s5 = inlined_call_operand.vmem [shape: f32[16,128], index: 5, kind: input, shape index: {}]   ;;  %s655_s6 = inlined_call_operand.vmem [shape: f32[1,640], index: 6, kind: input, shape index: {}]   ;;  %s656_s7 = inlined_call_operand.vmem [shape: f32[8,128], index: 7, kind: output, shape index: {}]  }
   0x1   :  { %s25_s25 = sshll.u32 %s534_s24, 4  ;;  %s510_s28 = scalar_lea.hbm %s652_s3, 128  ;;  %s26_s25 = int_to_ptr.vmem [resolvable:$true] %s25_s25 }
   0x2   :  { %p511_p0 = scmp.ne.s32.totalorder %s652_s3, %s510_s28  ;;  %p514_p1 = scmp.lt.u32.totalorder %s510_s28, %s652_s3 }
   0x4   :  { %p516_p2 = pnand %p514_p1, %p511_p0 }
   0x6   :  { %519 = shalt.err (!%p516_p2)
}
   0x7   :  { %s520_s10 = scalar_lea.vmem %s26_s25, 128  ;;  %p525_p4 = scmp.lt.s32.totalorder %s26_s25, %s26_s25 }
   0x8   :  { %p521_p3 = scmp.ne.s32.totalorder %s26_s25, %s520_s10  ;;  %p526_p5 = scmp.lt.s32.totalorder %s520_s10, %s520_s10 }
   0xa   :  { %p527_p6 = por %p526_p5, %p525_p4 }
   0xc   :  { %p528_p7 = pnand %p527_p6, %p521_p3 }
   0xe   :  { %531 = shalt.err (!%p528_p7)
}
   0xf   :  { %28 = dma.hbm_to_vmem [thread:$0]  %s652_s3, 128, %s26_s25, [#allocation3]  }
  0x10   :  { %532 = dma.done.wait [#allocation3], 128  }
  0x11   :  { %533 = vsyncadd [#allocation3], 4294967168  ;;  %v535_v0 = vmov 0.0   ;;  %vm536_vm0 = vmmov 0   ;;  %v537_v1 = vmov 0.0|0.0   ;;  %vm43_vm1 = vcmask 64512  }
  0x12   :  { %458 = vmatprep.subr.mxu0 %v535_v0  ;;  %460 = vmatprep.mubr.msk.f32.mxu0 %vm536_vm0, %v535_v0  ;;  %v42_v2 = vld [vmem:[#allocation2] sm:$0xff]  ;;  %v40_v5 = vld [vmem:[%s651_s2 + $0x8] sm:$0xff]  ;;  %vm117_vm2 = vcmask 130048   ;;  %v236_v11 = vld [vmem:[%s653_s4 + $0x10] sm:$0xff]  ;;  %vm193_vm3 = vcmask 261120   ;;  %v220_v36 = vlaneseq }
  0x13   :  { %491 = vmatprep.subr.bf16.mxu1 %v537_v1  ;;  %478 = vmatprep.mubr.msk.f32.mxu1 %vm536_vm0, %v535_v0  ;;  %v41_v3 = vld [vmem:[%s650_s1] sm:$0xff]  ;;  %v235_v9 = vld [vmem:[%s653_s4 + $0x8] sm:$0xff]  ;;  %v237_v12 = vld [vmem:[%s653_s4 + $0x18] sm:$0xff] }
  0x14   :  { %v39_v4 = vld [vmem:[%s651_s2] sm:$0xff]  ;;  %459 = vmatpush3.msra.mxu0 %v42_v2  ;;  %v495_v13 = vpack.c.bf16 %v237_v12, %v236_v11  ;;  %v221_v37 = vshrl.u32 %v220_v36, 7  ;;  %v354_v51 = vld [vmem:[%s654_s5 + $0x8] sm:$0xff] }
  0x15   :  { %461 = vmatmul.mubr.msk.f32.vlgmr.msra.gmra.mrb[0].mxu0 %vm43_vm1, %v41_v3  ;;  %488 = vmatprep.subr.bf16.mxu0 %v537_v1  ;;  %v489_v6 = vpack.c.bf16 %v40_v5, %v39_v4  ;;  %v38_v7 = vld [vmem:[%s649_s0] sm:$0xff] }
  0x16   :  { %467 = vmatprep.mubr.msk.f32.mxu0 %vm536_vm0, %v535_v0  ;;  %v234_v8 = vld [vmem:[%s653_s4] sm:$0xff]  ;;  %v222_v39 = vsub.s32 0, %v221_v37 }
  0x17   :  { %490 = vmatpush3.bf16.msra.mxu0 %v489_v6  ;;  %v492_v10 = vpack.c.bf16 %v235_v9, %v234_v8  ;;  %v191_v38 = vld [vmem:[%s655_s6] sm:$0x1]  ;;  %v192_v42 = vld [vmem:[%s655_s6 + $0x1] sm:$0x1]  ;;  %v311_v11 = vld [vmem:[%s655_s6 + $0x2] sm:$0x1] }
  0x18   :  { %497 = vmatprep.subr.bf16.mxu0 %v537_v1  ;;  %v353_v50 = vld [vmem:[%s654_s5] sm:$0xff] }
  0x19   :  { %493 = vmatpush3.bf16.msra.mxu1 %v492_v10  ;;  %v498_v52 = vpack.c.bf16 %v354_v51, %v353_v50 }
  0x1a   :  { %494 = vmatprep.subr.bf16.mxu1 %v537_v1 }
  0x1d   :  { %468 = vmatmul.mubr.msk.f32.vlgmr.msra.gmra.mrb[0].mxu0 %vm117_vm2, %v38_v7  ;;  %496 = vmatpush3.bf16.msra.mxu1 %v495_v13 }
  0x1e   :  { %485 = vmatprep.mubr.msk.f32.mxu0 %vm536_vm0, %v535_v0  ;;  %499 = vmatpush3.bf16.msra.mxu0 %v498_v52 }
  0xf0   :  { %v187_v14 = vpop.f32.mrb[0].mxu0 }
  0xf1   :  { %v194_v15 = vsel %vm193_vm3, %v187_v14, 0.0  ;;  %v203_v16 = vmul.f32 %v187_v14, %v187_v14  ;;  %v469_v17 = vpop.f32.mrb[1].mxu0 }
  0xf2   :  { %v195_v18 = vrot.slane %v194_v15, 4 }
  0xf3   :  { %v204_v19 = vsel %vm193_vm3, %v203_v16, 0.0 }
  0xf4   :  { %v196_v20 = vadd.f32 %v195_v18, %v194_v15  ;;  %v205_v21 = vrot.slane %v204_v19, 4 }
  0xf6   :  { %v197_v22 = vrot.slane %v196_v20, 2  ;;  %v206_v23 = vadd.f32 %v205_v21, %v204_v19 }
  0xf8   :  { %v198_v24 = vadd.f32 %v197_v22, %v196_v20  ;;  %v207_v25 = vrot.slane %v206_v23, 2  ;;  %v443_v22 = vld [vmem:[%s655_s6 + $0x4] ss:$0 sm:$0xff] }
  0xfa   :  { %v199_v26 = vrot.slane %v198_v24, 1  ;;  %v208_v27 = vadd.f32 %v207_v25, %v206_v23 }
  0xfc   :  { %v200_v28 = vadd.f32 %v199_v26, %v198_v24  ;;  %v209_v29 = vrot.slane %v208_v27, 1 }
  0xfe   :  { %v202_v30 = vmul.f32 0.125, %v200_v28  ;;  %v210_v31 = vadd.f32 %v209_v29, %v208_v27 }
 0x100   :  { %v211_v32 = vmul.f32 0.125, %v210_v31  ;;  %v212_v33 = vmul.f32 %v202_v30, %v202_v30 }
 0x102   :  { %v213_v34 = vsub.f32 %v211_v32, %v212_v33 }
 0x104   :  { %v214_v35 = vadd.f32 1e-05, %v213_v34 }
 0x106   :  { %506 = vrsqrt.f32 %v214_v35 }
 0x110   :  { %v507_v40 = vpop.eup %506 }
 0x111   :  { %v216_v41 = vmul.f32 %v507_v40, %v191_v38 }
 0x113   :  { %v217_v43 = vmul.f32 %v216_v41, %v202_v30  ;;  %v223_v44 = vrot.slane %v216_v41, %v222_v39 }
 0x115   :  { %v218_v45 = vsub.f32 %v192_v42, %v217_v43  ;;  %v225_v46 = vmul.f32 %v223_v44, %v187_v14  ;;  %v312_v14 = vld [vmem:[%s655_s6 + $0x3] sm:$0x1] }
 0x117   :  { %v230_v47 = vrot.slane %v218_v45, %v222_v39 }
 0x119   :  { %v232_v48 = vadd.f32 %v230_v47, %v225_v46 }
 0x11b   :  { %v233_v49 = vmax.f32 %v232_v48, 0.0 }
 0x11d   :  { %479 = vmatmul.mubr.msk.f32.vlgmr.msra.gmra.mrb[0].mxu1 %vm193_vm3, %v233_v49 }
 0x1f0   :  { %v307_v53 = vpop.f32.mrb[0].mxu1 }
 0x1f1   :  { %v313_v54 = vsel %vm117_vm2, %v307_v53, 0.0  ;;  %v321_v55 = vmul.f32 %v307_v53, %v307_v53  ;;  %v480_v56 = vpop.f32.mrb[1].mxu1 }
 0x1f2   :  { %v314_v57 = vrot.slane %v313_v54, 4 }
 0x1f3   :  { %v322_v58 = vsel %vm117_vm2, %v321_v55, 0.0 }
 0x1f4   :  { %v315_v59 = vadd.f32 %v314_v57, %v313_v54  ;;  %v323_v60 = vrot.slane %v322_v58, 4 }
 0x1f6   :  { %v316_v61 = vrot.slane %v315_v59, 2  ;;  %v324_v62 = vadd.f32 %v323_v60, %v322_v58 }
 0x1f8   :  { %v317_v63 = vadd.f32 %v316_v61, %v315_v59  ;;  %v325_v0 = vrot.slane %v324_v62, 2 }
 0x1fa   :  { %v318_v1 = vrot.slane %v317_v63, 1  ;;  %v326_v2 = vadd.f32 %v325_v0, %v324_v62 }
 0x1fc   :  { %v319_v3 = vadd.f32 %v318_v1, %v317_v63  ;;  %v327_v4 = vrot.slane %v326_v2, 1 }
 0x1fe   :  { %v320_v5 = vmul.f32 0.125, %v319_v3  ;;  %v328_v6 = vadd.f32 %v327_v4, %v326_v2 }
 0x200   :  { %v329_v7 = vmul.f32 0.125, %v328_v6  ;;  %v330_v8 = vmul.f32 %v320_v5, %v320_v5 }
 0x202   :  { %v331_v9 = vsub.f32 %v329_v7, %v330_v8 }
 0x204   :  { %v332_v10 = vadd.f32 1e-05, %v331_v9 }
 0x206   :  { %508 = vrsqrt.f32 %v332_v10 }
 0x210   :  { %v509_v12 = vpop.eup %508 }
 0x211   :  { %v334_v13 = vmul.f32 %v509_v12, %v311_v11 }
 0x213   :  { %v335_v15 = vmul.f32 %v334_v13, %v320_v5  ;;  %v341_v16 = vrot.slane %v334_v13, %v222_v39 }
 0x215   :  { %v336_v17 = vsub.f32 %v312_v14, %v335_v15  ;;  %v343_v18 = vmul.f32 %v341_v16, %v307_v53 }
 0x217   :  { %v348_v19 = vrot.slane %v336_v17, %v222_v39 }
 0x219   :  { %v350_v20 = vadd.f32 %v348_v19, %v343_v18 }
 0x21b   :  { %v351_v21 = vmax.f32 %v350_v20, 0.0 }
 0x21d   :  { %486 = vmatmul.mubr.msk.f32.vlgmr.msra.gmra.mrb[2].mxu0 %vm117_vm2, %v351_v21 }
 0x2f0   :  { %v430_v23 = vpop.f32.mrb[2].mxu0 }
 0x2f1   :  { %v431_v24 = vadd.f32 %v443_v22, %v430_v23  ;;  %v487_v25 = vpop.f32.mrb[3].mxu0 }
 0x2f3   :  { %434 = vst [vmem:[%s656_s7] sm:$0xff] %v431_v24 }
 0x2f4   :  { %439 = vsyncpa [#allocation3], 1 }

</bundles_post_ra>
